<compile_context>
chip_gen: v7x
topology: tpu7x:2x2x1
jax: 0.10.0
libtpu: 0.0.40
codegen_flags: <defaults>
</compile_context>

<pallas_src>
import functools

import jax
import jax.numpy as jnp
import numpy as np
from jax.experimental import pallas as pl
from jax.experimental.pallas import tpu as pltpu

BN_EPS = 1e-5
_VMEM = pl.BlockSpec(memory_space=pltpu.MemorySpace.VMEM)


# ----------------- shared math (used inside kernels AND by the reference) -----------------

def _dense(x, w_bf16, b):
    """Linear: bf16 MXU operands, f32 accumulation + f32 bias (single MXU pass)."""
    return jnp.dot(x.astype(jnp.bfloat16), w_bf16,
                   preferred_element_type=jnp.float32) + b


def _bn(x, gamma, beta):
    """BatchNorm1d, train-mode batch statistics (biased variance), f32 elementwise."""
    mean = jnp.mean(x, axis=0, keepdims=True)
    var = jnp.mean(jnp.square(x - mean), axis=0, keepdims=True)
    return (x - mean) * jax.lax.rsqrt(var + BN_EPS) * gamma + beta


def _mlp_bn(x, p, k, final_relu=False):
    """Sequential(Linear, ReLU, Linear, ReLU, BN); optional fused trailing ReLU."""
    h = jnp.maximum(_dense(x, p[k + "_w1"], p[k + "_b1"]), 0.0)
    h = jnp.maximum(_dense(h, p[k + "_w2"], p[k + "_b2"]), 0.0)
    y = _bn(h, p[k + "_g"], p[k + "_bt"])
    return jnp.maximum(y, 0.0) if final_relu else y


def _sigmoid(x):
    return 1.0 / (1.0 + jnp.exp(-x))


def _encoder_math(x, p):
    """Sequential(Linear, ReLU, Linear)."""
    h = jnp.maximum(_dense(x, p["w1"], p["b1"]), 0.0)
    return _dense(h, p["w2"], p["b2"])


def _varcon_math(source, target, edge_attr, p, eps, propagate):
    """VarConBipartiteLayer.forward + the outer F.relu of BipartiteGIN.forward."""
    # var_assignment: Linear -> ReLU -> Linear -> Sigmoid
    a = jnp.maximum(_dense(source, p["ass_w1"], p["ass_b1"]), 0.0)
    va = _sigmoid(_dense(a, p["ass_w2"], p["ass_b2"]))                     # (N_src, 1)
    # joint_var on cat([source, va]) with the weight fold (rank-1 VPU term for va)
    h = jnp.maximum(_dense(source, p["jv_w1s"], p["jv_b1"]) + va * p["jv_w1v"], 0.0)
    h = jnp.maximum(_dense(h, p["jv_w2"], p["jv_b2"]), 0.0)
    src2 = _bn(h, p["jv_g"], p["jv_bt"])
    edge_emb = _mlp_bn(edge_attr, p, "ee")
    tmp = (1.0 + eps) * target + propagate(src2, edge_emb)
    return _mlp_bn(tmp, p, "mlp", final_relu=True)


def _convar_math(source, target, edge_attr, p, eps, propagate):
    """ConVarBipartiteLayer.forward + the outer F.relu of BipartiteGIN.forward."""
    # joint_var on cat([source, source]) with the weight fold done at prep time
    h = jnp.maximum(_dense(source, p["jv_w1"], p["jv_b1"]), 0.0)
    h = jnp.maximum(_dense(h, p["jv_w2"], p["jv_b2"]), 0.0)
    src2 = _bn(h, p["jv_g"], p["jv_bt"])
    edge_emb = _mlp_bn(edge_attr, p, "ee")
    tmp = (1.0 + eps) * target + propagate(src2, edge_emb)
    return _mlp_bn(tmp, p, "mlp", final_relu=True)


def _propagate_onehot(src2, edge_emb, gather_oh, scatter_oh):
    """MessagePassing(aggr='add', flow='source_to_target'):
       msg_e = relu(x_src[src_idx[e]] + edge_emb[e]); scatter-add over target nodes.
       Gather/scatter are one-hot incidence matmuls on the MXU (bf16 0/1 is exact,
       f32 accumulation)."""
    x_j = jnp.dot(gather_oh, src2.astype(jnp.bfloat16),
                  preferred_element_type=jnp.float32)                      # (E, H)
    msg = jnp.maximum(x_j + edge_emb, 0.0)
    return jnp.dot(scatter_oh, msg.astype(jnp.bfloat16),
                   preferred_element_type=jnp.float32)                     # (N_tgt, H)


def _propagate_ref(src2, edge_emb, src_idx, tgt_idx, n_tgt):
    """Reference propagate: exact gather + segment_sum on the same bf16-quantized
    operands the MXU sees (independent check of the one-hot path)."""
    x_j = src2.astype(jnp.bfloat16).astype(jnp.float32)[src_idx]
    msg = jnp.maximum(x_j + edge_emb, 0.0)
    return jax.ops.segment_sum(msg.astype(jnp.bfloat16).astype(jnp.float32),
                               tgt_idx, num_segments=n_tgt)


# ------------------------------ fused Pallas kernels --------------------------------

_VARCON_KEYS = ("ass_w1", "ass_b1", "ass_w2", "ass_b2",
                "jv_w1s", "jv_w1v", "jv_b1", "jv_w2", "jv_b2", "jv_g", "jv_bt",
                "ee_w1", "ee_b1", "ee_w2", "ee_b2", "ee_g", "ee_bt",
                "mlp_w1", "mlp_b1", "mlp_w2", "mlp_b2", "mlp_g", "mlp_bt")

_CONVAR_KEYS = ("jv_w1", "jv_b1", "jv_w2", "jv_b2", "jv_g", "jv_bt",
                "ee_w1", "ee_b1", "ee_w2", "ee_b2", "ee_g", "ee_bt",
                "mlp_w1", "mlp_b1", "mlp_w2", "mlp_b2", "mlp_g", "mlp_bt")


def _encoder_kernel(x_ref, w1_ref, b1_ref, w2_ref, b2_ref, o_ref):
    p = {"w1": w1_ref[...], "b1": b1_ref[...], "w2": w2_ref[...], "b2": b2_ref[...]}
    o_ref[...] = _encoder_math(x_ref[...], p)


def _bipartite_kernel(*args, keys, math_fn, eps):
    # Whole bipartite layer fused: everything lives in vregs/VMEM, single output store.
    o_ref = args[-1]
    source, target, edge_attr, gather_oh, scatter_oh = [r[...] for r in args[:5]]
    p = {k: r[...] for k, r in zip(keys, args[5:-1])}
    prop = lambda s2, ee: _propagate_onehot(s2, ee, gather_oh, scatter_oh)
    o_ref[...] = math_fn(source, target, edge_attr, p, eps, prop)


def encoder_pallas(x, p):
    return pl.pallas_call(
        _encoder_kernel,
        out_shape=jax.ShapeDtypeStruct((x.shape[0], p["w2"].shape[1]), jnp.float32),
        in_specs=[_VMEM] * 5,
        out_specs=_VMEM,
    )(x, p["w1"], p["b1"], p["w2"], p["b2"])


def _bipartite_pallas(math_fn, keys, source, target, edge_attr, gather_oh, scatter_oh, p):
    inputs = (source, target, edge_attr, gather_oh, scatter_oh) + tuple(p[k] for k in keys)
    kernel = functools.partial(_bipartite_kernel, keys=keys, math_fn=math_fn,
                               eps=p["eps"])          # eps: static Python float
    return pl.pallas_call(
        kernel,
        out_shape=jax.ShapeDtypeStruct(target.shape, jnp.float32),
        in_specs=[_VMEM] * len(inputs),
        out_specs=_VMEM,
    )(*inputs)


def varcon_pallas(source, target, edge_attr, gather_oh, scatter_oh, p):
    return _bipartite_pallas(_varcon_math, _VARCON_KEYS,
                             source, target, edge_attr, gather_oh, scatter_oh, p)


def convar_pallas(source, target, edge_attr, gather_oh, scatter_oh, p):
    return _bipartite_pallas(_convar_math, _CONVAR_KEYS,
                             source, target, edge_attr, gather_oh, scatter_oh, p)


# ------------------------------ full model forward ----------------------------------

def bipartite_gin_forward(params, x_s, x_t, edge_attr, edge_index, use_pallas):
    con_idx, var_idx = edge_index[0], edge_index[1]
    ns, nt = x_s.shape[0], x_t.shape[0]

    if use_pallas:
        # One-hot incidence matrices (0/1 exact in bf16), built once and reused by
        # every message-passing round.
        # TODO(synk): at production graph sizes, replace these dense E x N incidence
        # matmuls with an edge-tiled grid + scalar-prefetched indices (VMEM-limited,
        # esp. v7x 64 MiB) and add a "parallel" grid axis to use v7x's 2 TensorCores.
        vc_gather = (var_idx[:, None] == jnp.arange(nt)[None, :]).astype(jnp.bfloat16)
        vc_scatter = (con_idx[None, :] == jnp.arange(ns)[:, None]).astype(jnp.bfloat16)
        cv_gather = (con_idx[:, None] == jnp.arange(ns)[None, :]).astype(jnp.bfloat16)
        cv_scatter = (var_idx[None, :] == jnp.arange(nt)[:, None]).astype(jnp.bfloat16)
        encoder = encoder_pallas
        varcon = lambda s, t, p: varcon_pallas(s, t, edge_attr, vc_gather, vc_scatter, p)
        convar = lambda s, t, p: convar_pallas(s, t, edge_attr, cv_gather, cv_scatter, p)
    else:
        encoder = _encoder_math
        varcon = lambda s, t, p: _varcon_math(
            s, t, edge_attr, p, p["eps"],
            lambda s2, ee: _propagate_ref(s2, ee, var_idx, con_idx, ns))
        convar = lambda s, t, p: _convar_math(
            s, t, edge_attr, p, p["eps"],
            lambda s2, ee: _propagate_ref(s2, ee, con_idx, var_idx, nt))

    x_var = [encoder(x_t, params["var_node_encoder"])]
    x_con = [encoder(x_s, params["con_node_encoder"])]
    for i in range(params["num_mp_layers"]):
        # VarConBipartiteLayer with inverse_edge_index: src = var nodes -> tgt = con nodes
        x_con.append(varcon(x_var[i], x_con[i], params["layers_var"][i]))
        # ConVarBipartiteLayer with edge_index:        src = con nodes -> tgt = var nodes
        x_var.append(convar(x_con[i + 1], x_var[i], params["layers_con"][i]))
    # JumpingKnowledge(mode='cat')
    return jnp.concatenate(x_con, -1), jnp.concatenate(x_var, -1)


# ------------------------------ parameter init / prep -------------------------------

class KeyGen:
    def __init__(self, key):
        self.key = key

    def __call__(self):
        self.key, sub = jax.random.split(self.key)
        return sub


def init_linear(kg, d_in, d_out):
    return {"w": jax.random.normal(kg(), (d_in, d_out), jnp.float32) * 0.1,
            "b": jax.random.normal(kg(), (d_out,), jnp.float32) * 0.1}


def init_seq2(kg, d_in, h):
    return {"l1": init_linear(kg, d_in, h), "l2": init_linear(kg, h, h)}


def init_seq2_bn(kg, d_in, h):
    return {"l1": init_linear(kg, d_in, h), "l2": init_linear(kg, h, h),
            "gamma": jnp.ones((h,), jnp.float32), "beta": jnp.zeros((h,), jnp.float32)}


def init_ass(kg, h):
    return {"l1": init_linear(kg, h, h), "l2": init_linear(kg, h, 1)}


def init_varcon(kg, edge_dim, h):
    return {"edge_encoder": init_seq2_bn(kg, edge_dim, h),
            "joint_var": init_seq2_bn(kg, h + 1, h),
            "mlp": init_seq2_bn(kg, h, h),
            "eps": 0.0}


def init_convar(kg, edge_dim, h):
    return {"edge_encoder": init_seq2_bn(kg, edge_dim, h),
            "joint_var": init_seq2_bn(kg, 2 * h, h),
            "mlp": init_seq2_bn(kg, h, h),
            "eps": 0.0}


def init_params(kg, in_xs, in_xt, edge_dim, hidden, num_layers):
    n_mp = num_layers - 1
    return {"num_mp_layers": n_mp,
            "var_node_encoder": init_seq2(kg, in_xt, hidden),
            "con_node_encoder": init_seq2(kg, in_xs, hidden),
            "layers_ass": [init_ass(kg, hidden) for _ in range(n_mp)],
            "layers_var": [init_varcon(kg, edge_dim, hidden) for _ in range(n_mp)],
            "layers_con": [init_convar(kg, edge_dim, hidden) for _ in range(n_mp)]}


def _prep_lin(lin):
    # bf16 weights (MXU operand), f32 (1, d_out) biases (pre-reshaped once).
    return lin["w"].astype(jnp.bfloat16), lin["b"].reshape(1, -1).astype(jnp.float32)


def _prep_block(out, prefix, block):
    out[prefix + "_w1"], out[prefix + "_b1"] = _prep_lin(block["l1"])
    out[prefix + "_w2"], out[prefix + "_b2"] = _prep_lin(block["l2"])
    out[prefix + "_g"] = block["gamma"].reshape(1, -1).astype(jnp.float32)
    out[prefix + "_bt"] = block["beta"].reshape(1, -1).astype(jnp.float32)


def prepare_varcon(layer, ass, hidden):
    p = {"eps": float(layer["eps"])}
    p["ass_w1"], p["ass_b1"] = _prep_lin(ass["l1"])
    p["ass_w2"], p["ass_b2"] = _prep_lin(ass["l2"])
    jv = layer["joint_var"]
    w1 = jv["l1"]["w"]                                       # (H+1, H)
    p["jv_w1s"] = w1[:hidden].astype(jnp.bfloat16)           # source block of the concat
    p["jv_w1v"] = w1[hidden:].astype(jnp.float32)            # (1, H) rank-1 term for va
    p["jv_b1"] = jv["l1"]["b"].reshape(1, -1).astype(jnp.float32)
    p["jv_w2"], p["jv_b2"] = _prep_lin(jv["l2"])
    p["jv_g"] = jv["gamma"].reshape(1, -1).astype(jnp.float32)
    p["jv_bt"] = jv["beta"].reshape(1, -1).astype(jnp.float32)
    _prep_block(p, "ee", layer["edge_encoder"])
    _prep_block(p, "mlp", layer["mlp"])
    return p


def prepare_convar(layer, hidden):
    p = {"eps": float(layer["eps"])}
    jv = layer["joint_var"]
    w1 = jv["l1"]["w"]                                       # (2H, H)
    p["jv_w1"] = (w1[:hidden] + w1[hidden:]).astype(jnp.bfloat16)   # concat fold (f32 sum)
    p["jv_b1"] = jv["l1"]["b"].reshape(1, -1).astype(jnp.float32)
    p["jv_w2"], p["jv_b2"] = _prep_lin(jv["l2"])
    p["jv_g"] = jv["gamma"].reshape(1, -1).astype(jnp.float32)
    p["jv_bt"] = jv["beta"].reshape(1, -1).astype(jnp.float32)
    _prep_block(p, "ee", layer["edge_encoder"])
    _prep_block(p, "mlp", layer["mlp"])
    return p


def prepare_encoder(enc):
    w1, b1 = _prep_lin(enc["l1"])
    w2, b2 = _prep_lin(enc["l2"])
    return {"w1": w1, "b1": b1, "w2": w2, "b2": b2}


def prepare_params(raw, hidden):
    return {
        "num_mp_layers": raw["num_mp_layers"],
        "var_node_encoder": prepare_encoder(raw["var_node_encoder"]),
        "con_node_encoder": prepare_encoder(raw["con_node_encoder"]),
        "layers_var": [prepare_varcon(lv, la, hidden)
                       for lv, la in zip(raw["layers_var"], raw["layers_ass"])],
        "layers_con": [prepare_convar(lc, hidden) for lc in raw["layers_con"]],
    }


# ---------------------------------------- main ---------------------------------------

if __name__ == "__main__":
    HIDDEN = 32
    NS, NT, E = 12, 16, 48          # constraint nodes, variable nodes, edges
    IN_XS, IN_XT, EDGE_DIM = 5, 6, 1
    NUM_LAYERS = 3                  # -> 2 message-passing rounds

    kg = KeyGen(jax.random.PRNGKey(0))
    raw = init_params(kg, IN_XS, IN_XT, EDGE_DIM, HIDDEN, NUM_LAYERS)
    params = prepare_params(raw, HIDDEN)

    x_s = jax.random.normal(kg(), (NS, IN_XS), jnp.float32)
    x_t = jax.random.normal(kg(), (NT, IN_XT), jnp.float32)
    edge_attr = jax.random.normal(kg(), (E, EDGE_DIM), jnp.float32)
    con_idx = jax.random.randint(kg(), (E,), 0, NS, dtype=jnp.int32)
    var_idx = jax.random.randint(kg(), (E,), 0, NT, dtype=jnp.int32)
    edge_index = jnp.stack([con_idx, var_idx], axis=0)

    xs_out, xt_out = bipartite_gin_forward(params, x_s, x_t, edge_attr,
                                           edge_index, use_pallas=True)
    jax.block_until_ready((xs_out, xt_out))

    xs_ref, xt_ref = bipartite_gin_forward(params, x_s, x_t, edge_attr,
                                           edge_index, use_pallas=False)
    np.testing.assert_allclose(np.asarray(xs_out), np.asarray(xs_ref),
                               atol=3e-3, rtol=3e-3)
    np.testing.assert_allclose(np.asarray(xt_out), np.asarray(xt_ref),
                               atol=3e-3, rtol=3e-3)
    assert xs_out.shape == (NS, HIDDEN * NUM_LAYERS)
    assert xt_out.shape == (NT, HIDDEN * NUM_LAYERS)
    print("KERNEL_OK")
</pallas_src>

<mosaic_0001>
module attributes {stable_mosaic.version = 11 : i64} {
  func.func @_encoder_kernel(%arg0: memref<16x6xf32, #tpu.memory_space<vmem>>, %arg1: memref<6x32xbf16, #tpu.memory_space<vmem>>, %arg2: memref<1x32xf32, #tpu.memory_space<vmem>>, %arg3: memref<32x32xbf16, #tpu.memory_space<vmem>>, %arg4: memref<1x32xf32, #tpu.memory_space<vmem>>, %arg5: memref<16x32xf32, #tpu.memory_space<vmem>>) attributes {dimension_semantics = [], scalar_prefetch = 0 : i64, scratch_operands = 0 : i64, tpu.core_type = #tpu.core_type<tc>} {
    %c0 = arith.constant 0 : index
    %c0_0 = arith.constant 0 : index
    %0 = vector.load %arg1[%c0, %c0_0] : memref<6x32xbf16, #tpu.memory_space<vmem>>, vector<6x32xbf16>
    %c0_1 = arith.constant 0 : index
    %c0_2 = arith.constant 0 : index
    %1 = vector.load %arg2[%c0_1, %c0_2] : memref<1x32xf32, #tpu.memory_space<vmem>>, vector<1x32xf32>
    %c0_3 = arith.constant 0 : index
    %c0_4 = arith.constant 0 : index
    %2 = vector.load %arg3[%c0_3, %c0_4] : memref<32x32xbf16, #tpu.memory_space<vmem>>, vector<32x32xbf16>
    %c0_5 = arith.constant 0 : index
    %c0_6 = arith.constant 0 : index
    %3 = vector.load %arg4[%c0_5, %c0_6] : memref<1x32xf32, #tpu.memory_space<vmem>>, vector<1x32xf32>
    %c0_7 = arith.constant 0 : index
    %c0_8 = arith.constant 0 : index
    %4 = vector.load %arg0[%c0_7, %c0_8] : memref<16x6xf32, #tpu.memory_space<vmem>>, vector<16x6xf32>
    %5 = arith.truncf %4 : vector<16x6xf32> to vector<16x6xbf16>
    %cst = arith.constant dense<0.000000e+00> : vector<16x32xf32>
    %6 = tpu.matmul %5, %0, %cst {dimension_numbers = #tpu.dot_dimension_numbers<[1], [0], [0], [1], [0, 0, 1, 1], [], []>} : vector<16x6xbf16>, vector<6x32xbf16>, vector<16x32xf32> -> vector<16x32xf32>
    %7 = vector.broadcast %1 : vector<1x32xf32> to vector<16x32xf32>
    %8 = arith.addf %6, %7 : vector<16x32xf32>
    %cst_9 = arith.constant 0.000000e+00 : f32
    %9 = vector.broadcast %cst_9 : f32 to vector<16x32xf32>
    %10 = arith.maximumf %8, %9 : vector<16x32xf32>
    %11 = arith.truncf %10 : vector<16x32xf32> to vector<16x32xbf16>
    %cst_10 = arith.constant dense<0.000000e+00> : vector<16x32xf32>
    %12 = tpu.matmul %11, %2, %cst_10 {dimension_numbers = #tpu.dot_dimension_numbers<[1], [0], [0], [1], [0, 0, 1, 1], [], []>} : vector<16x32xbf16>, vector<32x32xbf16>, vector<16x32xf32> -> vector<16x32xf32>
    %13 = vector.broadcast %3 : vector<1x32xf32> to vector<16x32xf32>
    %14 = arith.addf %12, %13 : vector<16x32xf32>
    %c0_11 = arith.constant 0 : index
    %c0_12 = arith.constant 0 : index
    %15 = vector.load %arg5[%c0_11, %c0_12] : memref<16x32xf32, #tpu.memory_space<vmem>>, vector<16x32xf32>
    tpu.vector_store %arg5[%c0_11, %c0_12], %14 {strides = array<i32>} : memref<16x32xf32, #tpu.memory_space<vmem>>, vector<16x32xf32>,
    return
  }
}

</mosaic_0001>

<bundles_post_ra>
// kernel: tpu_custom_call.1
= control target key start
LH: loop header
LB: loop body
LE: loop exit
PB: predicated region body
PF: predicated region fallthrough
CT: control target
= control target key end

     0   :  { %vm42_vm0 = vcmask 1042432   ;;  %v227_v2 = vmov 0.0   ;;  %vm228_vm1 = vmmov 0   ;;  %vm38_vm2 = vcmask 48128   ;;  %s295_s0 = inlined_call_operand.vmem [shape: f32[16,6], index: 0, kind: input, shape index: {}]   ;;  %s296_s1 = inlined_call_operand.vmem [shape: bf16[6,32], index: 1, kind: input, shape index: {}]   ;;  %s297_s2 = inlined_call_operand.vmem [shape: f32[1,32], index: 2, kind: input, shape index: {}]   ;;  %s298_s3 = inlined_call_operand.vmem [shape: bf16[32,32], index: 3, kind: input, shape index: {}]   ;;  %s299_s4 = inlined_call_operand.vmem [shape: f32[1,32], index: 4, kind: input, shape index: {}]   ;;  %s300_s5 = inlined_call_operand.hbm [shape: f32[16,32], index: 5, kind: output, shape index: {}]  }
   0x1   :  { %v22_v0 = vld [vmem:[%s296_s1] sm:$0x7]  ;;  %182 = vmatprep.subr.bf16.mxu0 %v227_v2  ;;  %184 = vmatprep.mubr.msk.bf16.mxu0 %vm228_vm1, %v227_v2  ;;  %v30_v4 = vld [vmem:[%s295_s0 + $0x8] sm:$0xff] }
   0x2   :  { %v29_v1 = vld [vmem:[%s295_s0] sm:$0xff]  ;;  %v44_v3 = vsel %vm42_vm0, %v22_v0, 0  ;;  %188 = vmatprep.subr.bf16.mxu1 %v227_v2  ;;  %192 = vmatprep.mubr.msk.bf16.mxu1 %vm228_vm1, %v227_v2 }
   0x3   :  { %183 = vmatpush3.bf16.msra.mxu0 %v44_v3  ;;  %v31_v5 = vpack.c.bf16 %v30_v4, %v29_v1 }
   0x4   :  { %10 = vsyncpa [#allocation3], 0  ;;  %v201_v6 = vld [vmem:[%s298_s3] sm:$0xff]   ;;  %v202_v7 = vld [vmem:[%s298_s3 + $0x8] sm:$0xff]   ;;  %vm108_vm3 = vcmask 261120   ;;  %s229_s3 = smov [#allocation2]  }
   0x5   :  { %189 = vmatpush3.bf16.msra.mxu1 %v201_v6  ;;  %v171_v8 = vld [vmem:[%s297_s2] ss:$0 sm:$0xff]  ;;  %s160_s30 = sshll.u32 %s229_s3, 4  ;;  %s161_s30 = int_to_ptr.vmem [resolvable:$true] %s160_s30 }
   0x6   :  { %185 = vmatmul.mubr.msk.bf16.vlgmr.msra.gmra.mrb[0].mxu0 %vm38_vm2, %v31_v5  ;;  %190 = vmatprep.subr.bf16.mxu1 %v227_v2  ;;  %v173_v18 = vld [vmem:[%s299_s4] ss:$0 sm:$0xff]  ;;  %s203_s2 = scalar_lea.vmem %s161_s30, 256  ;;  %p208_p1 = scmp.lt.s32.totalorder %s161_s30, %s161_s30 }
   0x7   :  { %p204_p0 = scmp.ne.s32.totalorder %s161_s30, %s203_s2  ;;  %p209_p2 = scmp.lt.s32.totalorder %s203_s2, %s203_s2 }
   0x9   :  { %191 = vmatpush3.bf16.msra.mxu1 %v202_v7  ;;  %p210_p3 = por %p209_p2, %p208_p1 }
   0xb   :  { %p211_p4 = pnand %p210_p3, %p204_p0 }
  0xd9   :  { %v80_v9 = vpop.f32.mrb[0].mxu0 }
  0xda   :  { %v81_v10 = vadd.f32 %v171_v8, %v80_v9  ;;  %v186_v11 = vpop.f32.mrb[1].mxu0 }
  0xdb   :  { %v83_v12 = vpop.f32.mrb[2].mxu0 }
  0xdc   :  { %v84_v13 = vadd.f32 %v171_v8, %v83_v12  ;;  %v187_v14 = vpop.f32.mrb[3].mxu0  ;;  %v87_v15 = vmax.f32 %v81_v10, 0.0 }
  0xde   :  { %v88_v16 = vmax.f32 %v84_v13, 0.0 }
  0xe0   :  { %v89_v17 = vpack.c.bf16 %v88_v16, %v87_v15 }
  0xe2   :  { %193 = vmatmul.mubr.msk.bf16.vlgmr.msra.gmra.mrb[0].mxu1 %vm108_vm3, %v89_v17 }
 0x1b5   :  { %v146_v19 = vpop.f32.mrb[0].mxu1 }
 0x1b6   :  { %v147_v20 = vadd.f32 %v173_v18, %v146_v19  ;;  %v194_v21 = vpop.f32.mrb[1].mxu1 }
 0x1b7   :  { %v149_v22 = vpop.f32.mrb[2].mxu1 }
 0x1b8   :  { %153 = vst.msk [vmem:[#allocation2] sm:$0xff] %vm108_vm3, %v147_v20  ;;  %v150_v23 = vadd.f32 %v173_v18, %v149_v22  ;;  %v195_v24 = vpop.f32.mrb[3].mxu1 }
 0x1ba   :  { %154 = vst.msk [vmem:[#allocation2 + $0x8] sm:$0xff] %vm108_vm3, %v150_v23 }
 0x1bb   :  { %214 = shalt.err (!%p211_p4)
}
 0x1bc   :  { %s215_s7 = scalar_lea.hbm %s300_s5, 256 }
 0x1bd   :  { %p216_p5 = scmp.ne.s32.totalorder %s300_s5, %s215_s7  ;;  %p219_p6 = scmp.lt.u32.totalorder %s215_s7, %s300_s5 }
 0x1bf   :  { %p221_p7 = pnand %p219_p6, %p216_p5 }
 0x1c1   :  { %224 = shalt.err (!%p221_p7)
}
 0x1c2   :  { %s230_s12 = smov 128   ;;  %s231_s13 = smov 8  }
 0x1c3   :  { %166 = dma.vmem_to_hbm [thread:$0]  %s161_s30, 256, %s300_s5, [#allocation3], %s230_s12, %s230_s12, %s231_s13  }
 0x1c4   :  { %225 = dma.done.wait [#allocation3], 256  }
 0x1c5   :  { %226 = vsyncadd [#allocation3], 4294967040 }
 0x1c6   :  { %170 = vsyncpa [#allocation3], 1 }

</bundles_post_ra>
